<compile_context>
chip_gen: v5e
topology: v5e:2x2
jax: 0.10.0
libtpu: 0.0.40
codegen_flags: <defaults>
</compile_context>

<pallas_src>
import jax
import jax.numpy as jnp
from jax.experimental import pallas as pl
from jax.experimental.pallas import tpu as pltpu


def _round_up(x, m):
    return ((x + m - 1) // m) * m


# -----------------------------------------------------------------------------
# Kernels
# -----------------------------------------------------------------------------
def _single_block_kernel(h_ref, w2_ref, b2_ref, o_ref):
    # Whole (padded) problem fits in VMEM: one MXU call, no grid machinery.
    o_ref[...] = (
        jnp.dot(h_ref[...], w2_ref[...], preferred_element_type=jnp.float32)
        + b2_ref[...]
    )


def _tiled_kernel(h_ref, w2_ref, b2_ref, o_ref):
    # Grid = (nj, nk): j tiles the output columns (parallel), k tiles the
    # reduction (arbitrary, innermost).  o_ref is resident across k (index map
    # (0, j)), so we accumulate straight into it -- no scratch accumulator.
    k = pl.program_id(1)

    @pl.when(k == 0)
    def _():
        o_ref[...] = jnp.zeros_like(o_ref)

    o_ref[...] += jnp.dot(h_ref[...], w2_ref[...], preferred_element_type=jnp.float32)

    @pl.when(k == pl.num_programs(1) - 1)
    def _():
        o_ref[...] += b2_ref[...]


# -----------------------------------------------------------------------------
# Tile selection (never asserts; minimal zero padding; tiles always divide the
# padded extents).
# -----------------------------------------------------------------------------
def _pick_tiles(out_dim, tn_req, tk_req):
    out_p0 = _round_up(out_dim, 128)
    tn_req = max(128, min(_round_up(tn_req, 128), out_p0))
    tk_req = max(128, min(_round_up(tk_req, 128), out_p0))

    # Choose the tile count first, then the smallest 128-multiple tile covering
    # out_p0 with that count.  (Fixes the old `out_p % tn` failure, e.g.
    # out_dim=384 with tn=256, tk=512.)
    nj = pl.cdiv(out_p0, tn_req)
    tn = _round_up(pl.cdiv(out_p0, nj), 128)
    nk = pl.cdiv(out_p0, tk_req)
    tk = _round_up(pl.cdiv(out_p0, nk), 128)

    # v7x: if the parallel j axis collapsed to 1 while k still iterates, split j
    # in two (only when it costs no extra padding) so both TensorCores get work.
    if nj == 1 and nk > 1 and tn % 256 == 0:
        nj, tn = 2, tn // 2

    out_p = nj * tn   # padded output-column extent (N axis)
    hid_p = nk * tk   # padded hidden / reduction extent (K axis)
    return nj, tn, out_p, nk, tk, hid_p


# -----------------------------------------------------------------------------
# Forward
# -----------------------------------------------------------------------------
def query_layer_forward(t, prev_hidden, params, n_queries, d_model, *, tn=2048, tk=2048):
    """Pallas TPU implementation of QueryLayer.forward.

    params (weights stored transposed vs. PyTorch, i.e. y = x @ W + b):
      'w1' (in_dim, out_dim)  'b1' (out_dim,)
      'w2' (out_dim, out_dim) 'b2' (out_dim,)
    Returns (n_queries, d_model) float32.
    """
    out_dim = n_queries * d_model
    in_dim = params["w1"].shape[0]

    # ---- glue: exactly torch's view / cat / last-layer select ----
    x = jnp.concatenate(
        [t.reshape(1, -1), prev_hidden[-1].reshape(1, -1)], axis=1
    ).astype(jnp.float32)
    assert x.shape[1] == in_dim, "t_dim + batch*hidden_size must match fcn1 in_features"

    # fcn1 is a tiny (1, in_dim)x(in_dim, out_dim) matvec -> plain XLA in f32.
    h = jnp.maximum(x @ params["w1"] + params["b1"][None, :], 0.0)

    nj, tn, out_p, nk, tk, hid_p = _pick_tiles(out_dim, tn, tk)

    # Zero padding: padded h columns and padded W2 rows are 0, so padded output
    # columns contribute exactly 0 and the final slice recovers the result.
    h_p = jnp.pad(h, ((0, 0), (0, hid_p - out_dim))).astype(jnp.bfloat16)
    w2_p = jnp.pad(
        params["w2"], ((0, hid_p - out_dim), (0, out_p - out_dim))
    ).astype(jnp.bfloat16)
    b2_p = jnp.pad(params["b2"], (0, out_p - out_dim)).astype(jnp.float32).reshape(1, out_p)

    if nj == 1 and nk == 1:
        # -------- single-block fast path (small out_dim) --------
        y = pl.pallas_call(
            _single_block_kernel,
            out_shape=jax.ShapeDtypeStruct((1, out_p), jnp.float32),
        )(h_p, w2_p, b2_p)
        return y[0, :out_dim].reshape(n_queries, d_model)

    # -------- tiled, W2-streaming path --------
    # Block-contiguous W2 layout (nj, nk, tk, tn): each streamed tile is one
    # contiguous multi-MB slab so the DMA engine runs at full HBM bandwidth.
    w2_blk = w2_p.reshape(nk, tk, nj, tn).transpose(2, 0, 1, 3)

    w2_bytes = hid_p * out_p * 2
    cost = pl.CostEstimate(
        flops=2 * hid_p * out_p,
        transcendentals=0,
        bytes_accessed=w2_bytes + nj * hid_p * 2 + nk * out_p * 4 + out_p * 4,
    )

    # VMEM budget: the double-buffered W2 tile dominates.  Clamp against the
    # device's physical VMEM (v7x has only 64 MiB per TensorCore) with headroom.
    needed = 2 * (tk * tn * 2) + 2 * (tk * 2) + 4 * (tn * 4)
    try:
        phys_vmem = int(pltpu.get_tpu_info().vmem_capacity_bytes)
    except Exception:
        phys_vmem = 64 * 1024 * 1024  # conservative: v7x per-TensorCore VMEM
    vmem_limit = max(32 * 1024 * 1024, needed + 8 * 1024 * 1024)
    vmem_limit = min(vmem_limit, int(phys_vmem * 0.85))

    grid_spec = pltpu.PrefetchScalarGridSpec(
        num_scalar_prefetch=0,
        grid=(nj, nk),
        in_specs=[
            pl.BlockSpec((1, tk), lambda j, k: (0, k)),                      # h (tiny)
            pl.BlockSpec((None, None, tk, tn), lambda j, k: (j, k, 0, 0)),   # W2 stream
            pl.BlockSpec((1, tn), lambda j, k: (0, j)),                      # b2
        ],
        out_specs=pl.BlockSpec((1, tn), lambda j, k: (0, j)),
    )

    y = pl.pallas_call(
        _tiled_kernel,
        out_shape=jax.ShapeDtypeStruct((1, out_p), jnp.float32),
        grid_spec=grid_spec,
        compiler_params=pltpu.CompilerParams(
            dimension_semantics=("parallel", "arbitrary"),  # N across TCs, K reduction
            vmem_limit_bytes=vmem_limit,
        ),
        cost_estimate=cost,
    )(h_p, w2_blk, b2_p)

    return y[0, :out_dim].reshape(n_queries, d_model)


# -----------------------------------------------------------------------------
# Reference + synthetic init
# -----------------------------------------------------------------------------
def reference_forward(t, prev_hidden, params, n_queries, d_model):
    """Plain-JAX reference mirroring the kernel's documented accuracy choice
    (f32 fcn1, bf16-quantized W2/h with f32 MXU accumulation)."""
    x = jnp.concatenate(
        [t.reshape(1, -1), prev_hidden[-1].reshape(1, -1)], axis=1
    ).astype(jnp.float32)
    h = jnp.maximum(x @ params["w1"] + params["b1"][None, :], 0.0)
    y = (
        jnp.dot(
            h.astype(jnp.bfloat16),
            params["w2"].astype(jnp.bfloat16),
            preferred_element_type=jnp.float32,
        )
        + params["b2"][None, :]
    )
    return y.reshape(n_queries, d_model)


def init_params(key, t_dim, hidden_size, n_queries, d_model):
    """nn.Linear-like init, weights stored transposed: (in, out)."""
    in_dim = t_dim + hidden_size
    out_dim = n_queries * d_model
    k1, k2, k3, k4 = jax.random.split(key, 4)
    b1 = 1.0 / jnp.sqrt(in_dim)
    b2 = 1.0 / jnp.sqrt(out_dim)
    return {
        "w1": jax.random.uniform(k1, (in_dim, out_dim), jnp.float32, -b1, b1),
        "b1": jax.random.uniform(k2, (out_dim,), jnp.float32, -b1, b1),
        "w2": jax.random.uniform(k3, (out_dim, out_dim), jnp.float32, -b2, b2),
        "b2": jax.random.uniform(k4, (out_dim,), jnp.float32, -b2, b2),
    }


if __name__ == "__main__":
    # Small shapes consistent with the module's forward: out_dim = 8*64 = 512.
    t_dim, hidden_size = 8, 32
    n_queries, d_model = 8, 64
    num_layers = 2

    key = jax.random.PRNGKey(0)
    kp, kt, kh = jax.random.split(key, 3)

    params = init_params(kp, t_dim, hidden_size, n_queries, d_model)
    t = jax.random.normal(kt, (t_dim,), jnp.float32)
    prev_hidden = jax.random.normal(kh, (num_layers, 1, hidden_size), jnp.float32)

    ref = reference_forward(t, prev_hidden, params, n_queries, d_model)

    # 1) default big tiles -> single-block fast path (whole problem in VMEM).
    out_fast = jax.block_until_ready(
        query_layer_forward(t, prev_hidden, params, n_queries, d_model)
    )
    assert out_fast.shape == (n_queries, d_model)
    assert jnp.allclose(out_fast, ref, atol=2e-2, rtol=2e-2), float(
        jnp.max(jnp.abs(out_fast - ref))
    )

    # 2) small explicit tiles -> exercises the tiled W2-streaming grid path
    #    (grid (2,2), block-contiguous W2, in-place f32 accumulation).
    out_tiled = jax.block_until_ready(
        query_layer_forward(t, prev_hidden, params, n_queries, d_model, tn=256, tk=256)
    )
    assert out_tiled.shape == (n_queries, d_model)
    assert jnp.allclose(out_tiled, ref, atol=2e-2, rtol=2e-2), float(
        jnp.max(jnp.abs(out_tiled - ref))
    )

    print("KERNEL_OK")
</pallas_src>

<mosaic_0001>
module attributes {stable_mosaic.version = 11 : i64} {
  func.func @_single_block_kernel(%arg0: memref<1x512xbf16, #tpu.memory_space<vmem>>, %arg1: memref<512x512xbf16, #tpu.memory_space<vmem>>, %arg2: memref<1x512xf32, #tpu.memory_space<vmem>>, %arg3: memref<1x512xf32, #tpu.memory_space<vmem>>) attributes {dimension_semantics = [], scalar_prefetch = 0 : i64, scratch_operands = 0 : i64, tpu.core_type = #tpu.core_type<tc>} {
    %c0 = arith.constant 0 : index
    %c0_0 = arith.constant 0 : index
    %0 = vector.load %arg0[%c0, %c0_0] : memref<1x512xbf16, #tpu.memory_space<vmem>>, vector<1x512xbf16>
    %c0_1 = arith.constant 0 : index
    %c0_2 = arith.constant 0 : index
    %1 = vector.load %arg1[%c0_1, %c0_2] : memref<512x512xbf16, #tpu.memory_space<vmem>>, vector<512x512xbf16>
    %cst = arith.constant dense<0.000000e+00> : vector<1x512xf32>
    %2 = tpu.matmul %0, %1, %cst {dimension_numbers = #tpu.dot_dimension_numbers<[1], [0], [0], [1], [0, 0, 1, 1], [], []>} : vector<1x512xbf16>, vector<512x512xbf16>, vector<1x512xf32> -> vector<1x512xf32>
    %c0_3 = arith.constant 0 : index
    %c0_4 = arith.constant 0 : index
    %3 = vector.load %arg2[%c0_3, %c0_4] : memref<1x512xf32, #tpu.memory_space<vmem>>, vector<1x512xf32>
    %4 = arith.addf %2, %3 : vector<1x512xf32>
    %c0_5 = arith.constant 0 : index
    %c0_6 = arith.constant 0 : index
    %5 = vector.load %arg3[%c0_5, %c0_6] : memref<1x512xf32, #tpu.memory_space<vmem>>, vector<1x512xf32>
    tpu.vector_store %arg3[%c0_5, %c0_6], %4 {strides = array<i32>} : memref<1x512xf32, #tpu.memory_space<vmem>>, vector<1x512xf32>,
    return
  }
}

</mosaic_0001>

<bundles_post_ra>
// kernel: tpu_custom_call.1
= control target key start
LH: loop header
LB: loop body
LE: loop exit
PB: predicated region body
PF: predicated region fallthrough
CT: control target
= control target key end

     0   :  { %8 = vsyncpa [#allocation3], 0  ;;  %s1902_s0 = inlined_call_operand.hbm [shape: bf16[1,512], index: 0, kind: input, shape index: {}]   ;;  %s1903_s1 = inlined_call_operand.hbm [shape: bf16[512,512], index: 1, kind: input, shape index: {}]   ;;  %s1904_s2 = inlined_call_operand.hbm [shape: f32[1,512], index: 2, kind: input, shape index: {}]   ;;  %s1905_s3 = inlined_call_operand.hbm [shape: f32[1,512], index: 3, kind: output, shape index: {}]  }
   0x1   :  { %9 = vsyncpa [#allocation6], 0  ;;  %s26_s14 = sshll.u32 %s1903_s1, 4  ;;  %s27_s14 = int_to_ptr.hbm [resolvable:$true] %s26_s14 }
   0x2   :  { %10 = vsyncpa [#allocation4], 0  ;;  %s1840_s15 = smov [#allocation5]   ;;  %s16_s19 = sshll.u32 %s1902_s0, 4  ;;  %s17_s19 = int_to_ptr.hbm [resolvable:$true] %s16_s19 }
   0x3   :  { %s28_s16 = sshll.u32 %s1840_s15, 4  ;;  %s1841_s20 = smov 256   ;;  %s29_s16 = int_to_ptr.vmem [resolvable:$true] %s28_s16 }
   0x4   :  { %s1842_s21 = smov 16   ;;  %s1843_s22 = smov [#allocation2]  }
   0x5   :  { %34 = dma.hbm_to_vmem [thread:$0]  %s27_s14, 16384, %s29_s16, [#allocation6], %s1841_s20, %s1841_s20, %s1842_s21  }
   0x6   :  { %s18_s23 = sshll.u32 %s1843_s22, 4  ;;  %s40_s26 = sshll.u32 %s1904_s2, 4  ;;  %s19_s23 = int_to_ptr.vmem [resolvable:$true] %s18_s23  ;;  %s41_s26 = int_to_ptr.hbm [resolvable:$true] %s40_s26 }
   0x7   :  { %21 = dma.hbm_to_vmem [thread:$0]  %s17_s19, 64, %s19_s23, [#allocation3]  }
   0x8   :  { %s1844_s1 = smov [#allocation7]  }
   0x9   :  { %s42_s27 = sshll.u32 %s1844_s1, 4  ;;  %s43_s27 = int_to_ptr.vmem [resolvable:$true] %s42_s27 }
   0xa   :  { %45 = dma.hbm_to_vmem [thread:$0]  %s41_s26, 64, %s43_s27, [#allocation6]  }
   0xb   :  { %1834 = dma.done.wait [#allocation3], 64  }
   0xc   :  { %1835 = vsyncadd [#allocation3], 4294967232 }
   0xd   :  { %1836 = dma.done.wait [#allocation6], 16448  }
   0xe   :  { %1837 = vsyncadd [#allocation6], 4294950848  ;;  %v1206_v0 = vld [vmem:[#allocation5 + $0xe0] sm:$0xf]  ;;  %v1634_v1 = vld [vmem:[#allocation5 + $0xec] sm:$0xf0] }
   0xf   :  { %v1334_v2 = vld [vmem:[#allocation5 + $0x1e0] sm:$0xf]  ;;  %v1207_v3 = vor.u32 %v1634_v1, %v1206_v0  ;;  %v1666_v4 = vld [vmem:[#allocation5 + $0x1ec] sm:$0xf0]  ;;  %vm1062_vm0 = vcmask 1040384   ;;  %vm1064_vm1 = vcmask 1042434  }
  0x10   :  { %v1462_v5 = vld [vmem:[#allocation5 + $0x2e0] sm:$0xf]  ;;  %v1698_v6 = vld [vmem:[#allocation5 + $0x2ec] sm:$0xf0]  ;;  %v1335_v7 = vor.u32 %v1666_v4, %v1334_v2  ;;  %s1845_s0 = smov [#allocation8]   ;;  %s1081_s30 = sshll.u32 %s1905_s3, 4  ;;  %s1082_s30 = int_to_ptr.hbm [resolvable:$true] %s1081_s30 }
  0x11   :  { %v1463_v8 = vor.u32 %v1698_v6, %v1462_v5  ;;  %v1590_v9 = vld [vmem:[#allocation5 + $0x3e0] sm:$0xf]  ;;  %v1730_v10 = vld [vmem:[#allocation5 + $0x3ec] sm:$0xf0]  ;;  %847 = vmatpush.bf16.msra.mxu0 %v1207_v3  ;;  %s1079_s2 = sshll.u32 %s1845_s0, 4  ;;  %vm1066_vm2 = vcmask 1041408   ;;  %s1080_s2 = int_to_ptr.vmem [resolvable:$true] %s1079_s2 }
  0x12   :  { %v1190_v11 = vld [vmem:[#allocation5 + $0xc0] sm:$0xf]  ;;  %v1591_v12 = vor.u32 %v1730_v10, %v1590_v9  ;;  %v1630_v13 = vld [vmem:[#allocation5 + $0xcc] sm:$0xf0]  ;;  %860 = vmatpush.bf16.msra.mxu1 %v1335_v7 }
  0x13   :  { %v1318_v14 = vld [vmem:[#allocation5 + $0x1c0] sm:$0xf]  ;;  %v1662_v15 = vld [vmem:[#allocation5 + $0x1cc] sm:$0xf0]  ;;  %873 = vmatpush.bf16.msra.mxu2 %v1463_v8  ;;  %v1191_v16 = vor.u32 %v1630_v13, %v1190_v11 }
  0x14   :  { %v1319_v17 = vor.u32 %v1662_v15, %v1318_v14  ;;  %v1446_v18 = vld [vmem:[#allocation5 + $0x2c0] sm:$0xf]  ;;  %v1694_v19 = vld [vmem:[#allocation5 + $0x2cc] sm:$0xf0]  ;;  %886 = vmatpush.bf16.msra.mxu3 %v1591_v12 }
  0x15   :  { %v1574_v20 = vld [vmem:[#allocation5 + $0x3c0] sm:$0xf]  ;;  %v1447_v21 = vor.u32 %v1694_v19, %v1446_v18  ;;  %v1726_v22 = vld [vmem:[#allocation5 + $0x3cc] sm:$0xf0]  ;;  %848 = vmatpush.bf16.msra.mxu0 %v1191_v16 }
  0x16   :  { %v1174_v23 = vld [vmem:[#allocation5 + $0xa0] sm:$0xf]  ;;  %v1626_v24 = vld [vmem:[#allocation5 + $0xac] sm:$0xf0]  ;;  %v1575_v25 = vor.u32 %v1726_v22, %v1574_v20  ;;  %861 = vmatpush.bf16.msra.mxu1 %v1319_v17 }
  0x17   :  { %v1302_v26 = vld [vmem:[#allocation5 + $0x1a0] sm:$0xf]  ;;  %v1658_v27 = vld [vmem:[#allocation5 + $0x1ac] sm:$0xf0]  ;;  %v1175_v29 = vor.u32 %v1626_v24, %v1174_v23  ;;  %874 = vmatpush.bf16.msra.mxu2 %v1447_v21 }
  0x18   :  { %v1430_v28 = vld [vmem:[#allocation5 + $0x2a0] sm:$0xf]  ;;  %v1690_v30 = vld [vmem:[#allocation5 + $0x2ac] sm:$0xf0]  ;;  %v1303_v33 = vor.u32 %v1658_v27, %v1302_v26  ;;  %887 = vmatpush.bf16.msra.mxu3 %v1575_v25 }
  0x19   :  { %v1558_v31 = vld [vmem:[#allocation5 + $0x3a0] sm:$0xf]  ;;  %v1722_v32 = vld [vmem:[#allocation5 + $0x3ac] sm:$0xf0]  ;;  %v1431_v34 = vor.u32 %v1690_v30, %v1430_v28  ;;  %849 = vmatpush.bf16.msra.mxu0 %v1175_v29  ;;  %v1632_v28 = vld [vmem:[#allocation5 + $0xe4] sm:$0xf] }
  0x1a   :  { %v1158_v35 = vld [vmem:[#allocation5 + $0x80] sm:$0xf]  ;;  %v1622_v36 = vld [vmem:[#allocation5 + $0x8c] sm:$0xf0]  ;;  %v1559_v38 = vor.u32 %v1722_v32, %v1558_v31  ;;  %862 = vmatpush.bf16.msra.mxu1 %v1303_v33  ;;  %v1208_v29 = vld [vmem:[#allocation5 + $0xf0] sm:$0xf0] }
  0x1b   :  { %v1286_v37 = vld [vmem:[#allocation5 + $0x180] sm:$0xf]  ;;  %v1654_v39 = vld [vmem:[#allocation5 + $0x18c] sm:$0xf0]  ;;  %v1159_v44 = vor.u32 %v1622_v36, %v1158_v35  ;;  %875 = vmatpush.bf16.msra.mxu2 %v1431_v34  ;;  %v1664_v30 = vld [vmem:[#allocation5 + $0x1e4] sm:$0xf] }
  0x1c   :  { %v1414_v40 = vld [vmem:[#allocation5 + $0x280] sm:$0xf]  ;;  %v1686_v41 = vld [vmem:[#allocation5 + $0x28c] sm:$0xf0]  ;;  %v1287_v45 = vor.u32 %v1654_v39, %v1286_v37  ;;  %888 = vmatpush.bf16.msra.mxu3 %v1559_v38  ;;  %v1336_v32 = vld [vmem:[#allocation5 + $0x1f0] sm:$0xf0] }
  0x1d   :  { %v1542_v42 = vld [vmem:[#allocation5 + $0x380] sm:$0xf]  ;;  %v1718_v43 = vld [vmem:[#allocation5 + $0x38c] sm:$0xf0]  ;;  %v1415_v46 = vor.u32 %v1686_v41, %v1414_v40  ;;  %850 = vmatpush.bf16.msra.mxu0 %v1159_v44  ;;  %v1696_v33 = vld [vmem:[#allocation5 + $0x2e4] sm:$0xf]  ;;  %v1211_v40 = vor.u32 %v1632_v28, %v1208_v29  ;;  %v1339_v41 = vor.u32 %v1664_v30, %v1336_v32 }
  0x1e   :  { %v1142_v47 = vld [vmem:[#allocation5 + $0x60] sm:$0xf]  ;;  %v1618_v48 = vld [vmem:[#allocation5 + $0x6c] sm:$0xf0]  ;;  %v1543_v50 = vor.u32 %v1718_v43, %v1542_v42  ;;  %863 = vmatpush.bf16.msra.mxu1 %v1287_v45  ;;  %v1464_v34 = vld [vmem:[#allocation5 + $0x2f0] sm:$0xf0] }
  0x1f   :  { %v1270_v49 = vld [vmem:[#allocation5 + $0x160] sm:$0xf]  ;;  %v1650_v51 = vld [vmem:[#allocation5 + $0x16c] sm:$0xf0]  ;;  %v1143_v56 = vor.u32 %v1618_v48, %v1142_v47  ;;  %876 = vmatpush.bf16.msra.mxu2 %v1415_v46  ;;  %v1728_v37 = vld [vmem:[#allocation5 + $0x3e4] sm:$0xf]  ;;  %v1467_v42 = vor.u32 %v1696_v33, %v1464_v34 }
  0x20   :  { %v1398_v52 = vld [vmem:[#allocation5 + $0x260] sm:$0xf]  ;;  %v1682_v53 = vld [vmem:[#allocation5 + $0x26c] sm:$0xf0]  ;;  %v1271_v57 = vor.u32 %v1650_v51, %v1270_v49  ;;  %889 = vmatpush.bf16.msra.mxu3 %v1543_v50  ;;  %v1592_v38 = vld [vmem:[#allocation5 + $0x3f0] sm:$0xf0] }
  0x21   :  { %v1526_v54 = vld [vmem:[#allocation5 + $0x360] sm:$0xf]  ;;  %v1714_v55 = vld [vmem:[#allocation5 + $0x36c] sm:$0xf0]  ;;  %v1399_v58 = vor.u32 %v1682_v53, %v1398_v52  ;;  %851 = vmatpush.bf16.msra.mxu0 %v1143_v56  ;;  %v1628_v43 = vld [vmem:[#allocation5 + $0xc4] sm:$0xf]  ;;  %v1595_v46 = vor.u32 %v1728_v37, %v1592_v38 }
  0x22   :  { %v1126_v59 = vld [vmem:[#allocation5 + $0x40] sm:$0xf]  ;;  %v1614_v60 = vld [vmem:[#allocation5 + $0x4c] sm:$0xf0]  ;;  %v1527_v62 = vor.u32 %v1714_v55, %v1526_v54  ;;  %864 = vmatpush.bf16.msra.mxu1 %v1271_v57  ;;  %v1192_v44 = vld [vmem:[#allocation5 + $0xd0] sm:$0xf0] }
  0x23   :  { %v1254_v61 = vld [vmem:[#allocation5 + $0x140] sm:$0xf]  ;;  %v1646_v63 = vld [vmem:[#allocation5 + $0x14c] sm:$0xf0]  ;;  %v1127_v4 = vor.u32 %v1614_v60, %v1126_v59  ;;  %877 = vmatpush.bf16.msra.mxu2 %v1399_v58  ;;  %v1660_v45 = vld [vmem:[#allocation5 + $0x1c4] sm:$0xf]  ;;  %v1195_v53 = vor.u32 %v1628_v43, %v1192_v44 }
  0x24   :  { %v1382_v0 = vld [vmem:[#allocation5 + $0x240] sm:$0xf]  ;;  %v1678_v1 = vld [vmem:[#allocation5 + $0x24c] sm:$0xf0]  ;;  %v1255_v5 = vor.u32 %v1646_v63, %v1254_v61  ;;  %890 = vmatpush.bf16.msra.mxu3 %v1527_v62  ;;  %v1320_v47 = vld [vmem:[#allocation5 + $0x1d0] sm:$0xf0] }
  0x25   :  { %v1510_v2 = vld [vmem:[#allocation5 + $0x340] sm:$0xf]  ;;  %v1710_v3 = vld [vmem:[#allocation5 + $0x34c] sm:$0xf0]  ;;  %v1383_v6 = vor.u32 %v1678_v1, %v1382_v0  ;;  %852 = vmatpush.bf16.msra.mxu0 %v1127_v4  ;;  %v1692_v48 = vld [vmem:[#allocation5 + $0x2c4] sm:$0xf]  ;;  %v1323_v54 = vor.u32 %v1660_v45, %v1320_v47 }
  0x26   :  { %v1110_v7 = vld [vmem:[#allocation5 + $0x20] sm:$0xf]  ;;  %v1610_v8 = vld [vmem:[#allocation5 + $0x2c] sm:$0xf0]  ;;  %v1511_v10 = vor.u32 %v1710_v3, %v1510_v2  ;;  %865 = vmatpush.bf16.msra.mxu1 %v1255_v5  ;;  %v1448_v49 = vld [vmem:[#allocation5 + $0x2d0] sm:$0xf0] }
  0x27   :  { %v1238_v9 = vld [vmem:[#allocation5 + $0x120] sm:$0xf]  ;;  %v1642_v11 = vld [vmem:[#allocation5 + $0x12c] sm:$0xf0]  ;;  %v1111_v16 = vor.u32 %v1610_v8, %v1110_v7  ;;  %878 = vmatpush.bf16.msra.mxu2 %v1383_v6  ;;  %v1724_v50 = vld [vmem:[#allocation5 + $0x3c4] sm:$0xf]  ;;  %v1451_v55 = vor.u32 %v1692_v48, %v1448_v49 }
  0x28   :  { %v1366_v12 = vld [vmem:[#allocation5 + $0x220] sm:$0xf]  ;;  %v1674_v13 = vld [vmem:[#allocation5 + $0x22c] sm:$0xf0]  ;;  %v1239_v19 = vor.u32 %v1642_v11, %v1238_v9  ;;  %891 = vmatpush.bf16.msra.mxu3 %v1511_v10  ;;  %v1576_v51 = vld [vmem:[#allocation5 + $0x3d0] sm:$0xf0] }
  0x29   :  { %v1494_v14 = vld [vmem:[#allocation5 + $0x320] sm:$0xf]  ;;  %v1706_v15 = vld [vmem:[#allocation5 + $0x32c] sm:$0xf0]  ;;  %v1367_v20 = vor.u32 %v1674_v13, %v1366_v12  ;;  %853 = vmatpush.bf16.msra.mxu0 %v1111_v16  ;;  %v58_v52 = vld [vmem:[#allocation2] sm:$0xf]  ;;  %v1579_v59 = vor.u32 %v1724_v50, %v1576_v51 }
  0x2a   :  { %v1094_v17 = vld [vmem:[#allocation5] sm:$0xf]  ;;  %v1606_v18 = vld [vmem:[#allocation5 + $0xc] sm:$0xf0]  ;;  %v1495_v24 = vor.u32 %v1706_v15, %v1494_v14  ;;  %866 = vmatpush.bf16.msra.mxu1 %v1239_v19  ;;  %189 = vst [vmem:[#allocation1] ss:$9 sm:$0xff] %v58_v52 }
  0x2b   :  { %v1222_v21 = vld [vmem:[#allocation5 + $0x100] sm:$0xf]  ;;  %v1638_v22 = vld [vmem:[#allocation5 + $0x10c] sm:$0xf0]  ;;  %v1095_v31 = vor.u32 %v1606_v18, %v1094_v17  ;;  %879 = vmatpush.bf16.msra.mxu2 %v1367_v20  ;;  %v1624_v56 = vld [vmem:[#allocation5 + $0xa4] sm:$0xf] }
  0x2c   :  { %v1350_v23 = vld [vmem:[#allocation5 + $0x200] sm:$0xf]  ;;  %v1670_v25 = vld [vmem:[#allocation5 + $0x20c] sm:$0xf0]  ;;  %v1223_v35 = vor.u32 %v1638_v22, %v1222_v21  ;;  %892 = vmatpush.bf16.msra.mxu3 %v1495_v24  ;;  %v1176_v57 = vld [vmem:[#allocation5 + $0xb0] sm:$0xf0] }
  0x2d   :  { %v1478_v26 = vld [vmem:[#allocation5 + $0x300] sm:$0xf]  ;;  %v1702_v27 = vld [vmem:[#allocation5 + $0x30c] sm:$0xf0]  ;;  %v1351_v36 = vor.u32 %v1670_v25, %v1350_v23  ;;  %854 = vmatpush.bf16.msra.mxu0 %v1095_v31  ;;  %v1656_v58 = vld [vmem:[#allocation5 + $0x1a4] sm:$0xf]  ;;  %v1179_v1 = vor.u32 %v1624_v56, %v1176_v57 }
  0x2e   :  { %v1479_v39 = vor.u32 %v1702_v27, %v1478_v26  ;;  %867 = vmatpush.bf16.msra.mxu1 %v1223_v35  ;;  %v1304_v60 = vld [vmem:[#allocation5 + $0x1b0] sm:$0xf0]  ;;  %v1688_v61 = vld [vmem:[#allocation5 + $0x2a4] sm:$0xf] }
  0x2f   :  { %880 = vmatpush.bf16.msra.mxu2 %v1351_v36  ;;  %v1432_v62 = vld [vmem:[#allocation5 + $0x2b0] sm:$0xf0]  ;;  %v1720_v63 = vld [vmem:[#allocation5 + $0x3a4] sm:$0xf]  ;;  %v1307_v3 = vor.u32 %v1656_v58, %v1304_v60 }
  0x30   :  { %893 = vmatpush.bf16.msra.mxu3 %v1479_v39  ;;  %v1560_v0 = vld [vmem:[#allocation5 + $0x3b0] sm:$0xf0]  ;;  %v1620_v2 = vld [vmem:[#allocation5 + $0x84] sm:$0xf]  ;;  %v1435_v4 = vor.u32 %v1688_v61, %v1432_v62 }
  0x31   :  { %899 = vmatpush.bf16.msrb.mxu0 %v1211_v40  ;;  %v1160_v5 = vld [vmem:[#allocation5 + $0x90] sm:$0xf0]  ;;  %v1652_v6 = vld [vmem:[#allocation5 + $0x184] sm:$0xf]  ;;  %v1563_v8 = vor.u32 %v1720_v63, %v1560_v0 }
  0x32   :  { %912 = vmatpush.bf16.msrb.mxu1 %v1339_v41  ;;  %v1288_v7 = vld [vmem:[#allocation5 + $0x190] sm:$0xf0]  ;;  %v1684_v9 = vld [vmem:[#allocation5 + $0x284] sm:$0xf]  ;;  %v1163_v15 = vor.u32 %v1620_v2, %v1160_v5  ;;  %v1635_v2 = vld [vmem:[#allocation5 + $0xf4] sm:$0xf0] }
  0x33   :  { %925 = vmatpush.bf16.msrb.mxu2 %v1467_v42  ;;  %v1416_v10 = vld [vmem:[#allocation5 + $0x290] sm:$0xf0]  ;;  %v1716_v11 = vld [vmem:[#allocation5 + $0x384] sm:$0xf]  ;;  %v1291_v18 = vor.u32 %v1652_v6, %v1288_v7  ;;  %v1667_v5 = vld [vmem:[#allocation5 + $0x1f4] sm:$0xf0] }
  0x34   :  { %938 = vmatpush.bf16.msrb.mxu3 %v1595_v46  ;;  %v1544_v12 = vld [vmem:[#allocation5 + $0x390] sm:$0xf0]  ;;  %v1875_v13 = vld [vmem:[#allocation1 + $0x12] sm:$0xff]  ;;  %v1882_v17 = vld [vmem:[#allocation1 + $0x9] sm:$0xff]  ;;  %v1419_v19 = vor.u32 %v1684_v9, %v1416_v10 }
  0x35   :  { %900 = vmatpush.bf16.msrb.mxu0 %v1195_v53  ;;  %v1877_v14 = vld [vmem:[#allocation1] sm:$0xff]  ;;  %881 = vmatmul.bf16.vlgmr.msra.gmra.mxu2 %v1875_v13  ;;  %v1616_v20 = vld [vmem:[#allocation5 + $0x64] sm:$0xf]  ;;  %v1547_v23 = vor.u32 %v1716_v11, %v1544_v12  ;;  %v1470_v6 = vld [vmem:[#allocation5 + $0x2e8] sm:$0xf] }
  0x36   :  { %913 = vmatpush.bf16.msrb.mxu1 %v1323_v54  ;;  %v1880_v16 = vld [vmem:[#allocation1 + $0x1b] sm:$0xff]  ;;  %v1648_v22 = vld [vmem:[#allocation5 + $0x164] sm:$0xf]  ;;  %855 = vmatmul.bf16.vlgmr.msra.gmra.mxu0 %v1877_v14  ;;  %v1699_v7 = vld [vmem:[#allocation5 + $0x2f4] sm:$0xf0] }
  0x37   :  { %926 = vmatpush.bf16.msrb.mxu2 %v1451_v55  ;;  %v1144_v21 = vld [vmem:[#allocation5 + $0x70] sm:$0xf0]  ;;  %v1680_v25 = vld [vmem:[#allocation5 + $0x264] sm:$0xf]  ;;  %894 = vmatmul.bf16.vlgmr.msra.gmra.mxu3 %v1880_v16  ;;  %v1598_v10 = vld [vmem:[#allocation5 + $0x3e8] sm:$0xf] }
  0x38   :  { %939 = vmatpush.bf16.msrb.mxu3 %v1579_v59  ;;  %v1272_v24 = vld [vmem:[#allocation5 + $0x170] sm:$0xf0]  ;;  %v1712_v27 = vld [vmem:[#allocation5 + $0x364] sm:$0xf]  ;;  %868 = vmatmul.bf16.vlgmr.msra.gmra.mxu1 %v1882_v17  ;;  %v1147_v29 = vor.u32 %v1616_v20, %v1144_v21  ;;  %v1731_v11 = vld [vmem:[#allocation5 + $0x3f4] sm:$0xf0] }
  0x39   :  { %901 = vmatpush.bf16.msrb.mxu0 %v1179_v1  ;;  %v1400_v26 = vld [vmem:[#allocation5 + $0x270] sm:$0xf0]  ;;  %v1275_v30 = vor.u32 %v1648_v22, %v1272_v24  ;;  %v1612_v32 = vld [vmem:[#allocation5 + $0x44] sm:$0xf]  ;;  %v1214_v1 = vld [vmem:[#allocation5 + $0xe8] sm:$0xf] }
  0x3a   :  { %914 = vmatpush.bf16.msrb.mxu1 %v1307_v3  ;;  %v1528_v28 = vld [vmem:[#allocation5 + $0x370] sm:$0xf0]  ;;  %v1403_v31 = vor.u32 %v1680_v25, %v1400_v26  ;;  %v1644_v34 = vld [vmem:[#allocation5 + $0x144] sm:$0xf]  ;;  %v1342_v3 = vld [vmem:[#allocation5 + $0x1e8] sm:$0xf] }
  0x3b   :  { %927 = vmatpush.bf16.msrb.mxu2 %v1435_v4  ;;  %v1128_v33 = vld [vmem:[#allocation5 + $0x50] sm:$0xf0]  ;;  %v1531_v35 = vor.u32 %v1712_v27, %v1528_v28  ;;  %v1676_v37 = vld [vmem:[#allocation5 + $0x244] sm:$0xf]  ;;  %v1198_v20 = vld [vmem:[#allocation5 + $0xc8] sm:$0xf] }
  0x3c   :  { %940 = vmatpush.bf16.msrb.mxu3 %v1563_v8  ;;  %v1256_v36 = vld [vmem:[#allocation5 + $0x150] sm:$0xf0]  ;;  %v1708_v39 = vld [vmem:[#allocation5 + $0x344] sm:$0xf]  ;;  %v1131_v41 = vor.u32 %v1612_v32, %v1128_v33  ;;  %v1631_v21 = vld [vmem:[#allocation5 + $0xd4] sm:$0xf0] }
  0x3d   :  { %902 = vmatpush.bf16.msrb.mxu0 %v1163_v15  ;;  %v1384_v38 = vld [vmem:[#allocation5 + $0x250] sm:$0xf0]  ;;  %v1259_v42 = vor.u32 %v1644_v34, %v1256_v36  ;;  %v1608_v44 = vld [vmem:[#allocation5 + $0x24] sm:$0xf]  ;;  %v1215_v15 = vor.u32 %v1635_v2, %v1214_v1  ;;  %v1326_v22 = vld [vmem:[#allocation5 + $0x1c8] sm:$0xf] }
  0x3e   :  { %915 = vmatpush.bf16.msrb.mxu1 %v1291_v18  ;;  %v1512_v40 = vld [vmem:[#allocation5 + $0x350] sm:$0xf0]  ;;  %v1387_v43 = vor.u32 %v1676_v37, %v1384_v38  ;;  %v1640_v46 = vld [vmem:[#allocation5 + $0x124] sm:$0xf]  ;;  %v1343_v18 = vor.u32 %v1667_v5, %v1342_v3  ;;  %v1663_v24 = vld [vmem:[#allocation5 + $0x1d4] sm:$0xf0] }
  0x3f   :  { %928 = vmatpush.bf16.msrb.mxu2 %v1419_v19  ;;  %v1112_v45 = vld [vmem:[#allocation5 + $0x30] sm:$0xf0]  ;;  %v1515_v47 = vor.u32 %v1708_v39, %v1512_v40  ;;  %v1672_v49 = vld [vmem:[#allocation5 + $0x224] sm:$0xf]  ;;  %v1471_v19 = vor.u32 %v1699_v7, %v1470_v6  ;;  %v1454_v25 = vld [vmem:[#allocation5 + $0x2c8] sm:$0xf] }
  0x40   :  { %941 = vmatpush.bf16.msrb.mxu3 %v1547_v23  ;;  %v1240_v48 = vld [vmem:[#allocation5 + $0x130] sm:$0xf0]  ;;  %v1704_v51 = vld [vmem:[#allocation5 + $0x324] sm:$0xf]  ;;  %v1115_v53 = vor.u32 %v1608_v44, %v1112_v45  ;;  %v1599_v23 = vor.u32 %v1731_v11, %v1598_v10  ;;  %v1695_v26 = vld [vmem:[#allocation5 + $0x2d4] sm:$0xf0] }
  0x41   :  { %903 = vmatpush.bf16.msrb.mxu0 %v1147_v29  ;;  %v1368_v50 = vld [vmem:[#allocation5 + $0x230] sm:$0xf0]  ;;  %v1604_v54 = vld [vmem:[#allocation5 + $0x4] sm:$0xf]  ;;  %v1243_v56 = vor.u32 %v1640_v46, %v1240_v48  ;;  %v1582_v27 = vld [vmem:[#allocation5 + $0x3c8] sm:$0xf]  ;;  %v1199_v29 = vor.u32 %v1631_v21, %v1198_v20 }
  0x42   :  { %916 = vmatpush.bf16.msrb.mxu1 %v1275_v30  ;;  %v1496_v52 = vld [vmem:[#allocation5 + $0x330] sm:$0xf0]  ;;  %v1371_v57 = vor.u32 %v1672_v49, %v1368_v50  ;;  %v1636_v58 = vld [vmem:[#allocation5 + $0x104] sm:$0xf]  ;;  %v1727_v28 = vld [vmem:[#allocation5 + $0x3d4] sm:$0xf0]  ;;  %v1327_v30 = vor.u32 %v1663_v24, %v1326_v22 }
  0x43   :  { %929 = vmatpush.bf16.msrb.mxu2 %v1403_v31  ;;  %v1096_v55 = vld [vmem:[#allocation5 + $0x10] sm:$0xf0]  ;;  %v1668_v60 = vld [vmem:[#allocation5 + $0x204] sm:$0xf]  ;;  %v1499_v61 = vor.u32 %v1704_v51, %v1496_v52  ;;  %v1455_v31 = vor.u32 %v1695_v26, %v1454_v25  ;;  %v1182_v32 = vld [vmem:[#allocation5 + $0xa8] sm:$0xf] }
  0x44   :  { %942 = vmatpush.bf16.msrb.mxu3 %v1531_v35  ;;  %v1224_v59 = vld [vmem:[#allocation5 + $0x110] sm:$0xf0]  ;;  %v1700_v63 = vld [vmem:[#allocation5 + $0x304] sm:$0xf]  ;;  %v1099_v4 = vor.u32 %v1604_v54, %v1096_v55  ;;  %v1627_v33 = vld [vmem:[#allocation5 + $0xb4] sm:$0xf0]  ;;  %v1583_v35 = vor.u32 %v1727_v28, %v1582_v27 }
  0x45   :  { %904 = vmatpush.bf16.msrb.mxu0 %v1131_v41  ;;  %v1352_v62 = vld [vmem:[#allocation5 + $0x210] sm:$0xf0]  ;;  %v1227_v8 = vor.u32 %v1636_v58, %v1224_v59  ;;  %v1310_v34 = vld [vmem:[#allocation5 + $0x1a8] sm:$0xf]  ;;  %v1659_v36 = vld [vmem:[#allocation5 + $0x1b4] sm:$0xf0]  ;;  %v1183_v41 = vor.u32 %v1627_v33, %v1182_v32 }
  0x46   :  { %917 = vmatpush.bf16.msrb.mxu1 %v1259_v42  ;;  %v1480_v0 = vld [vmem:[#allocation5 + $0x310] sm:$0xf0]  ;;  %v1355_v9 = vor.u32 %v1668_v60, %v1352_v62  ;;  %v1438_v37 = vld [vmem:[#allocation5 + $0x2a8] sm:$0xf]  ;;  %v1691_v38 = vld [vmem:[#allocation5 + $0x2b4] sm:$0xf0]  ;;  %v1311_v42 = vor.u32 %v1659_v36, %v1310_v34 }
  0x47   :  { %930 = vmatpush.bf16.msrb.mxu2 %v1387_v43  ;;  %v1483_v12 = vor.u32 %v1700_v63, %v1480_v0  ;;  %v1566_v39 = vld [vmem:[#allocation5 + $0x3a8] sm:$0xf]  ;;  %v1723_v40 = vld [vmem:[#allocation5 + $0x3b4] sm:$0xf0]  ;;  %v1439_v43 = vor.u32 %v1691_v38, %v1438_v37 }
  0x48   :  { %943 = vmatpush.bf16.msrb.mxu3 %v1515_v47  ;;  %v1166_v44 = vld [vmem:[#allocation5 + $0x88] sm:$0xf]  ;;  %v1623_v45 = vld [vmem:[#allocation5 + $0x94] sm:$0xf0]  ;;  %v1567_v47 = vor.u32 %v1723_v40, %v1566_v39 }
  0x49   :  { %905 = vmatpush.bf16.msrb.mxu0 %v1115_v53  ;;  %v1294_v46 = vld [vmem:[#allocation5 + $0x188] sm:$0xf]  ;;  %v1655_v48 = vld [vmem:[#allocation5 + $0x194] sm:$0xf0]  ;;  %v1167_v53 = vor.u32 %v1623_v45, %v1166_v44  ;;  %v1344_v45 = vld [vmem:[#allocation5 + $0x1f8] sm:$0xf0] }
  0x4a   :  { %918 = vmatpush.bf16.msrb.mxu1 %v1243_v56  ;;  %v1422_v49 = vld [vmem:[#allocation5 + $0x288] sm:$0xf]  ;;  %v1687_v50 = vld [vmem:[#allocation5 + $0x294] sm:$0xf0]  ;;  %v1295_v54 = vor.u32 %v1655_v48, %v1294_v46  ;;  %v1697_v46 = vld [vmem:[#allocation5 + $0x2ec] sm:$0xf] }
  0x4b   :  { %931 = vmatpush.bf16.msrb.mxu2 %v1371_v57  ;;  %v1550_v51 = vld [vmem:[#allocation5 + $0x388] sm:$0xf]  ;;  %v1719_v52 = vld [vmem:[#allocation5 + $0x394] sm:$0xf0]  ;;  %v1423_v55 = vor.u32 %v1687_v50, %v1422_v49  ;;  %v1729_v50 = vld [vmem:[#allocation5 + $0x3ec] sm:$0xf] }
  0x4c   :  { %944 = vmatpush.bf16.msrb.mxu3 %v1499_v61  ;;  %v1150_v56 = vld [vmem:[#allocation5 + $0x68] sm:$0xf]  ;;  %v1619_v57 = vld [vmem:[#allocation5 + $0x74] sm:$0xf0]  ;;  %v1551_v59 = vor.u32 %v1719_v52, %v1550_v51  ;;  %v1600_v51 = vld [vmem:[#allocation5 + $0x3f8] sm:$0xf0] }
  0x4d   :  { %906 = vmatpush.bf16.msrb.mxu0 %v1099_v4  ;;  %v1278_v58 = vld [vmem:[#allocation5 + $0x168] sm:$0xf]  ;;  %v1651_v60 = vld [vmem:[#allocation5 + $0x174] sm:$0xf0]  ;;  %v1151_v1 = vor.u32 %v1619_v57, %v1150_v56  ;;  %v1629_v56 = vld [vmem:[#allocation5 + $0xcc] sm:$0xf] }
  0x4e   :  { %919 = vmatpush.bf16.msrb.mxu1 %v1227_v8  ;;  %v1406_v61 = vld [vmem:[#allocation5 + $0x268] sm:$0xf]  ;;  %v1683_v62 = vld [vmem:[#allocation5 + $0x274] sm:$0xf0]  ;;  %v1279_v2 = vor.u32 %v1651_v60, %v1278_v58  ;;  %v1200_v57 = vld [vmem:[#allocation5 + $0xd8] sm:$0xf0] }
  0x4f   :  { %932 = vmatpush.bf16.msrb.mxu2 %v1355_v9  ;;  %v1534_v63 = vld [vmem:[#allocation5 + $0x368] sm:$0xf]  ;;  %v1715_v0 = vld [vmem:[#allocation5 + $0x374] sm:$0xf0]  ;;  %v1407_v3 = vor.u32 %v1683_v62, %v1406_v61  ;;  %v1661_v58 = vld [vmem:[#allocation5 + $0x1cc] sm:$0xf] }
  0x50   :  { %945 = vmatpush.bf16.msrb.mxu3 %v1483_v12  ;;  %907 = vmatmul.bf16.vlgmr.msrb.gmra.mxu0 %v1877_v14  ;;  %v1134_v4 = vld [vmem:[#allocation5 + $0x48] sm:$0xf]  ;;  %v1615_v5 = vld [vmem:[#allocation5 + $0x54] sm:$0xf0]  ;;  %v1535_v7 = vor.u32 %v1715_v0, %v1534_v63  ;;  %v1328_v60 = vld [vmem:[#allocation5 + $0x1d8] sm:$0xf0] }
  0x51   :  { %951 = vmatpush.bf16.msra.mxu0 %v1215_v15  ;;  %920 = vmatmul.bf16.vlgmr.msrb.gmra.mxu1 %v1882_v17  ;;  %v1262_v6 = vld [vmem:[#allocation5 + $0x148] sm:$0xf]  ;;  %v1647_v8 = vld [vmem:[#allocation5 + $0x154] sm:$0xf0]  ;;  %v1135_v15 = vor.u32 %v1615_v5, %v1134_v4  ;;  %v1693_v61 = vld [vmem:[#allocation5 + $0x2cc] sm:$0xf] }
  0x52   :  { %964 = vmatpush.bf16.msra.mxu1 %v1343_v18  ;;  %933 = vmatmul.bf16.vlgmr.msrb.gmra.mxu2 %v1875_v13  ;;  %v1390_v9 = vld [vmem:[#allocation5 + $0x248] sm:$0xf]  ;;  %v1679_v10 = vld [vmem:[#allocation5 + $0x254] sm:$0xf0]  ;;  %v1263_v18 = vor.u32 %v1647_v8, %v1262_v6  ;;  %v1456_v62 = vld [vmem:[#allocation5 + $0x2d8] sm:$0xf0] }
  0x53   :  { %977 = vmatpush.bf16.msra.mxu2 %v1471_v19  ;;  %946 = vmatmul.bf16.vlgmr.msrb.gmra.mxu3 %v1880_v16  ;;  %v1518_v11 = vld [vmem:[#allocation5 + $0x348] sm:$0xf]  ;;  %v1711_v12 = vld [vmem:[#allocation5 + $0x354] sm:$0xf0]  ;;  %v1391_v19 = vor.u32 %v1679_v10, %v1390_v9  ;;  %v1725_v63 = vld [vmem:[#allocation5 + $0x3cc] sm:$0xf] }
  0x54   :  { %990 = vmatpush.bf16.msra.mxu3 %v1599_v23  ;;  %v1118_v20 = vld [vmem:[#allocation5 + $0x28] sm:$0xf]  ;;  %v1611_v21 = vld [vmem:[#allocation5 + $0x34] sm:$0xf0]  ;;  %v1519_v23 = vor.u32 %v1711_v12, %v1518_v11  ;;  %v1584_v0 = vld [vmem:[#allocation5 + $0x3d8] sm:$0xf0] }
  0x55   :  { %952 = vmatpush.bf16.msra.mxu0 %v1199_v29  ;;  %v1246_v22 = vld [vmem:[#allocation5 + $0x128] sm:$0xf]  ;;  %v1643_v24 = vld [vmem:[#allocation5 + $0x134] sm:$0xf0]  ;;  %v1119_v29 = vor.u32 %v1611_v21, %v1118_v20  ;;  %v1625_v4 = vld [vmem:[#allocation5 + $0xac] sm:$0xf] }
  0x56   :  { %965 = vmatpush.bf16.msra.mxu1 %v1327_v30  ;;  %v1374_v25 = vld [vmem:[#allocation5 + $0x228] sm:$0xf]  ;;  %v1675_v26 = vld [vmem:[#allocation5 + $0x234] sm:$0xf0]  ;;  %v1247_v32 = vor.u32 %v1643_v24, %v1246_v22  ;;  %v1184_v5 = vld [vmem:[#allocation5 + $0xb8] sm:$0xf0] }
  0x57   :  { %978 = vmatpush.bf16.msra.mxu2 %v1455_v31  ;;  %v1502_v27 = vld [vmem:[#allocation5 + $0x328] sm:$0xf]  ;;  %v1707_v28 = vld [vmem:[#allocation5 + $0x334] sm:$0xf0]  ;;  %v1375_v33 = vor.u32 %v1675_v26, %v1374_v25  ;;  %v1657_v6 = vld [vmem:[#allocation5 + $0x1ac] sm:$0xf] }
  0x58   :  { %991 = vmatpush.bf16.msra.mxu3 %v1583_v35  ;;  %v1102_v30 = vld [vmem:[#allocation5 + $0x8] sm:$0xf]  ;;  %v1607_v31 = vld [vmem:[#allocation5 + $0x14] sm:$0xf0]  ;;  %v1503_v37 = vor.u32 %v1707_v28, %v1502_v27  ;;  %v1312_v8 = vld [vmem:[#allocation5 + $0x1b8] sm:$0xf0] }
  0x59   :  { %953 = vmatpush.bf16.msra.mxu0 %v1183_v41  ;;  %v1230_v34 = vld [vmem:[#allocation5 + $0x108] sm:$0xf]  ;;  %v1639_v35 = vld [vmem:[#allocation5 + $0x114] sm:$0xf0]  ;;  %v1633_v41 = vld [vmem:[#allocation5 + $0xec] sm:$0xf]  ;;  %v1103_v44 = vor.u32 %v1607_v31, %v1102_v30 }
  0x5a   :  { %966 = vmatpush.bf16.msra.mxu1 %v1311_v42  ;;  %v1358_v36 = vld [vmem:[#allocation5 + $0x208] sm:$0xf]  ;;  %v1671_v38 = vld [vmem:[#allocation5 + $0x214] sm:$0xf0]  ;;  %v1216_v42 = vld [vmem:[#allocation5 + $0xf8] sm:$0xf0]  ;;  %v1231_v48 = vor.u32 %v1639_v35, %v1230_v34 }
  0x5b   :  { %979 = vmatpush.bf16.msra.mxu2 %v1439_v43  ;;  %v1486_v39 = vld [vmem:[#allocation5 + $0x308] sm:$0xf]  ;;  %v1703_v40 = vld [vmem:[#allocation5 + $0x314] sm:$0xf0]  ;;  %v1665_v43 = vld [vmem:[#allocation5 + $0x1ec] sm:$0xf]  ;;  %v1359_v49 = vor.u32 %v1671_v38, %v1358_v36 }
  0x5c   :  { %992 = vmatpush.bf16.msra.mxu3 %v1567_v47  ;;  %v1472_v47 = vld [vmem:[#allocation5 + $0x2f8] sm:$0xf0]  ;;  %v1487_v52 = vor.u32 %v1703_v40, %v1486_v39  ;;  %v1689_v9 = vld [vmem:[#allocation5 + $0x2ac] sm:$0xf] }
  0x5d   :  { %954 = vmatpush.bf16.msra.mxu0 %v1167_v53  ;;  %v1219_v53 = vor.u32 %v1633_v41, %v1216_v42  ;;  %v1440_v10 = vld [vmem:[#allocation5 + $0x2b8] sm:$0xf0]  ;;  %v1721_v11 = vld [vmem:[#allocation5 + $0x3ac] sm:$0xf] }
  0x5e   :  { %967 = vmatpush.bf16.msra.mxu1 %v1295_v54  ;;  %v1347_v54 = vor.u32 %v1665_v43, %v1344_v45  ;;  %v1568_v12 = vld [vmem:[#allocation5 + $0x3b8] sm:$0xf0]  ;;  %v1621_v20 = vld [vmem:[#allocation5 + $0x8c] sm:$0xf] }
  0x5f   :  { %980 = vmatpush.bf16.msra.mxu2 %v1423_v55  ;;  %v1475_v55 = vor.u32 %v1697_v46, %v1472_v47  ;;  %v1168_v21 = vld [vmem:[#allocation5 + $0x98] sm:$0xf0]  ;;  %v1653_v22 = vld [vmem:[#allocation5 + $0x18c] sm:$0xf] }
  0x60   :  { %993 = vmatpush.bf16.msra.mxu3 %v1551_v59  ;;  %v1603_v59 = vor.u32 %v1729_v50, %v1600_v51  ;;  %v1296_v24 = vld [vmem:[#allocation5 + $0x198] sm:$0xf0]  ;;  %v1685_v25 = vld [vmem:[#allocation5 + $0x28c] sm:$0xf] }
  0x61   :  { %955 = vmatpush.bf16.msra.mxu0 %v1151_v1  ;;  %v1203_v1 = vor.u32 %v1629_v56, %v1200_v57  ;;  %v1424_v26 = vld [vmem:[#allocation5 + $0x298] sm:$0xf0]  ;;  %v1717_v27 = vld [vmem:[#allocation5 + $0x38c] sm:$0xf]  ;;  %v1299_v30 = vor.u32 %v1653_v22, %v1296_v24 }
  0x62   :  { %968 = vmatpush.bf16.msra.mxu1 %v1279_v2  ;;  %v1331_v2 = vor.u32 %v1661_v58, %v1328_v60  ;;  %v1552_v28 = vld [vmem:[#allocation5 + $0x398] sm:$0xf0]  ;;  %v1427_v31 = vor.u32 %v1685_v25, %v1424_v26  ;;  %v1649_v34 = vld [vmem:[#allocation5 + $0x16c] sm:$0xf] }
  0x63   :  { %981 = vmatpush.bf16.msra.mxu2 %v1407_v3  ;;  %v1459_v3 = vor.u32 %v1693_v61, %v1456_v62  ;;  %v1555_v35 = vor.u32 %v1717_v27, %v1552_v28  ;;  %v1280_v36 = vld [vmem:[#allocation5 + $0x178] sm:$0xf0]  ;;  %v1713_v39 = vld [vmem:[#allocation5 + $0x36c] sm:$0xf] }
  0x64   :  { %994 = vmatpush.bf16.msra.mxu3 %v1535_v7  ;;  %v1587_v7 = vor.u32 %v1725_v63, %v1584_v0  ;;  %v1408_v38 = vld [vmem:[#allocation5 + $0x278] sm:$0xf0]  ;;  %v1283_v42 = vor.u32 %v1649_v34, %v1280_v36  ;;  %v1645_v46 = vld [vmem:[#allocation5 + $0x14c] sm:$0xf] }
  0x65   :  { %956 = vmatpush.bf16.msra.mxu0 %v1135_v15  ;;  %v1187_v15 = vor.u32 %v1625_v4, %v1184_v5  ;;  %v1536_v40 = vld [vmem:[#allocation5 + $0x378] sm:$0xf0]  ;;  %v1709_v51 = vld [vmem:[#allocation5 + $0x34c] sm:$0xf] }
  0x66   :  { %969 = vmatpush.bf16.msra.mxu1 %v1263_v18  ;;  %v1315_v18 = vor.u32 %v1657_v6, %v1312_v8  ;;  %v1136_v45 = vld [vmem:[#allocation5 + $0x58] sm:$0xf0]  ;;  %v1539_v47 = vor.u32 %v1713_v39, %v1536_v40  ;;  %v1609_v56 = vld [vmem:[#allocation5 + $0x2c] sm:$0xf] }
  0x67   :  { %982 = vmatpush.bf16.msra.mxu2 %v1391_v19  ;;  %v1443_v19 = vor.u32 %v1689_v9, %v1440_v10  ;;  %v1392_v50 = vld [vmem:[#allocation5 + $0x258] sm:$0xf0]  ;;  %v1641_v58 = vld [vmem:[#allocation5 + $0x12c] sm:$0xf] }
  0x68   :  { %995 = vmatpush.bf16.msra.mxu3 %v1519_v23  ;;  %v1571_v23 = vor.u32 %v1721_v11, %v1568_v12  ;;  %v1120_v57 = vld [vmem:[#allocation5 + $0x38] sm:$0xf0]  ;;  %v1673_v61 = vld [vmem:[#allocation5 + $0x22c] sm:$0xf] }
  0x69   :  { %957 = vmatpush.bf16.msra.mxu0 %v1119_v29  ;;  %v1171_v29 = vor.u32 %v1621_v20, %v1168_v21  ;;  %v1248_v60 = vld [vmem:[#allocation5 + $0x138] sm:$0xf0]  ;;  %v1705_v63 = vld [vmem:[#allocation5 + $0x32c] sm:$0xf]  ;;  %v187_v21 = vld [vmem:[#allocation7] sm:$0xf] }
  0x6a   :  { %970 = vmatpush.bf16.msra.mxu1 %v1247_v32  ;;  %v1617_v32 = vld [vmem:[#allocation5 + $0x6c] sm:$0xf]  ;;  %v1376_v62 = vld [vmem:[#allocation5 + $0x238] sm:$0xf0]  ;;  %v839_v22 = vperm.slane %v187_v21, 0 }
  0x6b   :  { %983 = vmatpush.bf16.msra.mxu2 %v1375_v33  ;;  %v1152_v33 = vld [vmem:[#allocation5 + $0x78] sm:$0xf0]  ;;  %v1605_v4 = vld [vmem:[#allocation5 + $0xc] sm:$0xf] }
  0x6c   :  { %996 = vmatpush.bf16.msra.mxu3 %v1503_v37  ;;  %v1681_v37 = vld [vmem:[#allocation5 + $0x26c] sm:$0xf]  ;;  %v1155_v41 = vor.u32 %v1617_v32, %v1152_v33  ;;  %v1504_v0 = vld [vmem:[#allocation5 + $0x338] sm:$0xf0] }
  0x6d   :  { %958 = vmatpush.bf16.msra.mxu0 %v1103_v44  ;;  %v1411_v43 = vor.u32 %v1681_v37, %v1408_v38  ;;  %v1613_v44 = vld [vmem:[#allocation5 + $0x4c] sm:$0xf]  ;;  %v1104_v5 = vld [vmem:[#allocation5 + $0x18] sm:$0xf0] }
  0x6e   :  { %971 = vmatpush.bf16.msra.mxu1 %v1231_v48  ;;  %v1264_v48 = vld [vmem:[#allocation5 + $0x158] sm:$0xf0]  ;;  %v1637_v6 = vld [vmem:[#allocation5 + $0x10c] sm:$0xf] }
  0x6f   :  { %984 = vmatpush.bf16.msra.mxu2 %v1359_v49  ;;  %v1677_v49 = vld [vmem:[#allocation5 + $0x24c] sm:$0xf]  ;;  %v1232_v8 = vld [vmem:[#allocation5 + $0x118] sm:$0xf0] }
  0x70   :  { %997 = vmatpush.bf16.msra.mxu3 %v1487_v52  ;;  %959 = vmatmul.bf16.vlgmr.msra.gmra.mxu0 %v1877_v14  ;;  %v1520_v52 = vld [vmem:[#allocation5 + $0x358] sm:$0xf0]  ;;  %v1669_v9 = vld [vmem:[#allocation5 + $0x20c] sm:$0xf] }
  0x71   :  { %1003 = vmatpush.bf16.msrb.mxu0 %v1219_v53  ;;  %972 = vmatmul.bf16.vlgmr.msra.gmra.mxu1 %v1882_v17  ;;  %v1139_v53 = vor.u32 %v1613_v44, %v1136_v45  ;;  %v1360_v10 = vld [vmem:[#allocation5 + $0x218] sm:$0xf0]  ;;  %v1701_v11 = vld [vmem:[#allocation5 + $0x30c] sm:$0xf] }
  0x72   :  { %1016 = vmatpush.bf16.msrb.mxu1 %v1347_v54  ;;  %985 = vmatmul.bf16.vlgmr.msra.gmra.mxu2 %v1875_v13  ;;  %v1267_v54 = vor.u32 %v1645_v46, %v1264_v48  ;;  %v1488_v12 = vld [vmem:[#allocation5 + $0x318] sm:$0xf0]  ;;  %v841_v48 = vperm.slane %v187_v21, 2 }
  0x73   :  { %1029 = vmatpush.bf16.msrb.mxu2 %v1475_v55  ;;  %998 = vmatmul.bf16.vlgmr.msra.gmra.mxu3 %v1880_v16  ;;  %v1395_v55 = vor.u32 %v1677_v49, %v1392_v50  ;;  %v1491_v20 = vor.u32 %v1701_v11, %v1488_v12 }
  0x74   :  { %1042 = vmatpush.bf16.msrb.mxu3 %v1603_v59  ;;  %v1523_v59 = vor.u32 %v1709_v51, %v1520_v52  ;;  %v842_v51 = vperm.slane %v187_v21, 3 }
  0x75   :  { %1004 = vmatpush.bf16.msrb.mxu0 %v1203_v1  ;;  %v1123_v1 = vor.u32 %v1609_v56, %v1120_v57 }
  0x76   :  { %1017 = vmatpush.bf16.msrb.mxu1 %v1331_v2  ;;  %v1251_v2 = vor.u32 %v1641_v58, %v1248_v60 }
  0x77   :  { %1030 = vmatpush.bf16.msrb.mxu2 %v1459_v3  ;;  %v1379_v3 = vor.u32 %v1673_v61, %v1376_v62 }
  0x78   :  { %1043 = vmatpush.bf16.msrb.mxu3 %v1587_v7  ;;  %v1507_v7 = vor.u32 %v1705_v63, %v1504_v0 }
  0x79   :  { %1005 = vmatpush.bf16.msrb.mxu0 %v1187_v15  ;;  %v1107_v15 = vor.u32 %v1605_v4, %v1104_v5 }
  0x7a   :  { %1018 = vmatpush.bf16.msrb.mxu1 %v1315_v18  ;;  %v1235_v18 = vor.u32 %v1637_v6, %v1232_v8 }
  0x7b   :  { %1031 = vmatpush.bf16.msrb.mxu2 %v1443_v19  ;;  %v1363_v19 = vor.u32 %v1669_v9, %v1360_v10 }
  0x7c   :  { %1044 = vmatpush.bf16.msrb.mxu3 %v1571_v23 }
  0x7d   :  { %1006 = vmatpush.bf16.msrb.mxu0 %v1171_v29 }
  0x7e   :  { %1019 = vmatpush.bf16.msrb.mxu1 %v1299_v30 }
  0x7f   :  { %1032 = vmatpush.bf16.msrb.mxu2 %v1427_v31 }
  0x80   :  { %1045 = vmatpush.bf16.msrb.mxu3 %v1555_v35 }
  0x81   :  { %1007 = vmatpush.bf16.msrb.mxu0 %v1155_v41 }
  0x82   :  { %1020 = vmatpush.bf16.msrb.mxu1 %v1283_v42 }
  0x83   :  { %1033 = vmatpush.bf16.msrb.mxu2 %v1411_v43 }
  0x84   :  { %1046 = vmatpush.bf16.msrb.mxu3 %v1539_v47  ;;  %v840_v47 = vperm.slane %v187_v21, 1 }
  0x85   :  { %1008 = vmatpush.bf16.msrb.mxu0 %v1139_v53 }
  0x86   :  { %1021 = vmatpush.bf16.msrb.mxu1 %v1267_v54 }
  0x87   :  { %1034 = vmatpush.bf16.msrb.mxu2 %v1395_v55 }
  0x88   :  { %1047 = vmatpush.bf16.msrb.mxu3 %v1523_v59 }
  0x89   :  { %1009 = vmatpush.bf16.msrb.mxu0 %v1123_v1 }
  0x8a   :  { %1022 = vmatpush.bf16.msrb.mxu1 %v1251_v2 }
  0x8b   :  { %1035 = vmatpush.bf16.msrb.mxu2 %v1379_v3  ;;  %v1069_v3 = vlaneseq }
  0x8c   :  { %1048 = vmatpush.bf16.msrb.mxu3 %v1507_v7 }
  0x8d   :  { %1010 = vmatpush.bf16.msrb.mxu0 %v1107_v15  ;;  %vm1071_vm3 = vcmp.lt.s32.totalorder %v1069_v3, 512 }
  0x8e   :  { %1023 = vmatpush.bf16.msrb.mxu1 %v1235_v18 }
  0x8f   :  { %1036 = vmatpush.bf16.msrb.mxu2 %v1363_v19 }
  0x90   :  { %1049 = vmatpush.bf16.msrb.mxu3 %v1491_v20  ;;  %1011 = vmatmul.bf16.vlgmr.msrb.gmra.mxu0 %v1877_v14 }
  0x91   :  { %1024 = vmatmul.bf16.vlgmr.msrb.gmra.mxu1 %v1882_v17 }
  0x92   :  { %1037 = vmatmul.bf16.vlgmr.msrb.gmra.mxu2 %v1875_v13 }
  0x93   :  { %1050 = vmatmul.bf16.vlgmr.msrb.gmra.mxu3 %v1880_v16 }
  0xb3   :  { %v856_v23 = vpop.f32.mrf.mxu0 }
  0xb4   :  { %v857_v24 = vadd.f32 %v856_v23, %v839_v22 }
  0xb5   :  { %v869_v25 = vpop.f32.mrf.mxu1 }
  0xb6   :  { %v870_v26 = vadd.f32 %v869_v25, %v857_v24 }
  0xb8   :  { %v882_v27 = vpop.f32.mrf.mxu2 }
  0xb9   :  { %v883_v28 = vadd.f32 %v882_v27, %v870_v26 }
  0xba   :  { %v895_v29 = vpop.f32.mrf.mxu3 }
  0xbb   :  { %v896_v30 = vadd.f32 %v895_v29, %v883_v28  ;;  %v858_v31 = vpop.f32.mrf.mxu0 }
  0xbd   :  { %v871_v32 = vpop.f32.mrf.mxu1 }
  0xc0   :  { %v884_v33 = vpop.f32.mrf.mxu2 }
  0xc2   :  { %v897_v14 = vpop.f32.mrf.mxu3 }
  0xcd   :  { %v908_v34 = vpop.f32.mrf.mxu0 }
  0xce   :  { %v921_v17 = vpop.f32.mrf.mxu1  ;;  %v909_v49 = vadd.f32 %v908_v34, %v840_v47 }
  0xd0   :  { %v922_v52 = vadd.f32 %v921_v17, %v909_v49 }
  0xd5   :  { %v934_v35 = vpop.f32.mrf.mxu2  ;;  %v910_v36 = vpop.f32.mrf.mxu0 }
  0xd6   :  { %v947_v13 = vpop.f32.mrf.mxu3  ;;  %v923_v16 = vpop.f32.mrf.mxu1  ;;  %v935_v57 = vadd.f32 %v934_v35, %v922_v52 }
  0xd8   :  { %v948_v60 = vadd.f32 %v947_v13, %v935_v57 }
  0xda   :  { %v1059_v4 = vrot.slane %v948_v60, 7 }
  0xdc   :  { %v1063_v8 = vsel %vm1062_vm0, %v896_v30, %v1059_v4 }
  0xdd   :  { %v936_v37 = vpop.f32.mrf.mxu2 }
  0xde   :  { %v949_v38 = vpop.f32.mrf.mxu3 }
  0xed   :  { %v960_v39 = vpop.f32.mrf.mxu0 }
  0xee   :  { %v973_v40 = vpop.f32.mrf.mxu1  ;;  %v961_v50 = vadd.f32 %v960_v39, %v841_v48 }
  0xf0   :  { %v974_v53 = vadd.f32 %v973_v40, %v961_v50 }
  0xf5   :  { %v986_v41 = vpop.f32.mrf.mxu2  ;;  %v962_v43 = vpop.f32.mrf.mxu0 }
  0xf6   :  { %v999_v42 = vpop.f32.mrf.mxu3  ;;  %v975_v44 = vpop.f32.mrf.mxu1  ;;  %v987_v58 = vadd.f32 %v986_v41, %v974_v53 }
  0xf8   :  { %v1000_v62 = vadd.f32 %v999_v42, %v987_v58 }
  0xfa   :  { %v1060_v6 = vrot.slane %v1000_v62, 6 }
  0xfd   :  { %v988_v45 = vpop.f32.mrf.mxu2 }
  0xfe   :  { %v1001_v46 = vpop.f32.mrf.mxu3 }
 0x10d   :  { %v1012_v54 = vpop.f32.mrf.mxu0 }
 0x10e   :  { %v1013_v55 = vadd.f32 %v1012_v54, %v842_v51  ;;  %v1025_v56 = vpop.f32.mrf.mxu1 }
 0x110   :  { %v1026_v59 = vadd.f32 %v1025_v56, %v1013_v55 }
 0x115   :  { %v1038_v61 = vpop.f32.mrf.mxu2  ;;  %v1014_v1 = vpop.f32.mrf.mxu0 }
 0x116   :  { %v1039_v63 = vadd.f32 %v1038_v61, %v1026_v59  ;;  %v1051_v0 = vpop.f32.mrf.mxu3  ;;  %v1027_v2 = vpop.f32.mrf.mxu1 }
 0x118   :  { %v1052_v5 = vadd.f32 %v1051_v0, %v1039_v63 }
 0x11a   :  { %v1061_v7 = vrot.slane %v1052_v5, 5 }
 0x11c   :  { %v1065_v9 = vsel %vm1064_vm1, %v1060_v6, %v1061_v7 }
 0x11d   :  { %v1040_v10 = vpop.f32.mrf.mxu2  ;;  %v1067_v11 = vsel %vm1066_vm2, %v1063_v8, %v1065_v9 }
 0x11e   :  { %v1053_v12 = vpop.f32.mrf.mxu3  ;;  %1073 = vst.msk [vmem:[#allocation8] sm:$0xf] %vm1071_vm3, %v1067_v11 }
 0x11f   :  { %1084 = dma.vmem_to_hbm [thread:$0]  %s1080_s2, 64, %s1082_s30, [#allocation4]  }
 0x120   :  { %1838 = dma.done.wait [#allocation4], 64  }
 0x121   :  { %1839 = vsyncadd [#allocation4], 4294967232 }
 0x122   :  { %1089 = vsyncpa [#allocation3], 1 }
 0x123   :  { %1090 = vsyncpa [#allocation6], 1 }
 0x124   :  { %1091 = vsyncpa [#allocation4], 1 }

</bundles_post_ra>
